<compile_context>
chip_gen: v7x
topology: tpu7x:2x2x1
jax: 0.10.0
libtpu: 0.0.40
codegen_flags: <defaults>
</compile_context>

<pallas_src>
import numpy as np
import jax
import jax.numpy as jnp
from jax.experimental import pallas as pl
from jax.experimental.pallas import tpu as pltpu

# ---- "hps" (hyper-params) chosen small but consistent with the module ----
PRENET_INPUT_DIM = 32
PRENET_OUT_SIZES = [32, 32]
PRENET_DROPOUT_P = 0.5

LANE = 128        # vreg lane width
SUBLANE = 8       # vreg sublane width
TM_MAX = 512      # row-tile sweet spot (fits easily in v7x's 64 MiB VMEM too)


def _round_up(n, m):
    return ((n + m - 1) // m) * m


# ----------------------------- fused kernel --------------------------------
def _make_prenet_kernel(n_layers, training, compute_dtype, out_dtype):
    """Fused Prenet body.

    refs = (x, w_0..w_{L-1}, [mask_0..mask_{L-1}], out)
      x      : (TM, K_pad)        compute_dtype (bf16)
      w_l    : (K_pad_l, N_pad_l) compute_dtype, zero-padded, (in, out) layout
      mask_l : (TM, N_pad_l)      compute_dtype, pre-scaled keep multiplier
      out    : (TM, N_pad_last)   out_dtype (f32), lane-dense
    """
    def kernel(*refs):
        x_ref = refs[0]
        w_refs = refs[1:1 + n_layers]
        m_refs = refs[1 + n_layers:1 + 2 * n_layers] if training else ()
        o_ref = refs[-1]

        h = x_ref[...]                                        # bf16 in vregs
        y = None
        for li in range(n_layers):
            y = jnp.dot(h, w_refs[li][...],
                        preferred_element_type=jnp.float32)   # MXU, f32 acc
            y = jnp.maximum(y, 0.0)                           # relu (VPU, f32)
            if training:
                # inverted dropout: mask is 0 or 1/(1-p)
                y = y * m_refs[li][...].astype(jnp.float32)
            h = y.astype(compute_dtype)                       # feed next MXU
        o_ref[...] = y.astype(out_dtype)
    return kernel


# ----------------------------- weight prep ---------------------------------
def prepare_prenet_weights(weights, compute_dtype=jnp.bfloat16):
    """One-time glue (NOT per forward call): transpose PyTorch (out, in) ->
    (in, out), zero-pad both dims to multiples of 128, cast to compute dtype."""
    wts, out_dims = [], []
    for w in weights:
        out_d, in_d = w.shape
        wt = jnp.zeros((_round_up(in_d, LANE), _round_up(out_d, LANE)),
                       compute_dtype)
        wt = wt.at[:in_d, :out_d].set(jnp.transpose(w).astype(compute_dtype))
        wts.append(wt)
        out_dims.append(out_d)
    return {"wts": wts,
            "in_dim": weights[0].shape[1],
            "out_dims": out_dims,
            "compute_dtype": compute_dtype}


# ----------------------------- forward wrapper ------------------------------
def prenet_forward(x, prepared, *, p=PRENET_DROPOUT_P, training=False, rng=None):
    """x: (..., D_in). prepared: output of prepare_prenet_weights."""
    wts = prepared["wts"]
    in_dim = prepared["in_dim"]
    out_dims = prepared["out_dims"]
    cdtype = prepared["compute_dtype"]
    n_layers = len(wts)

    lead = x.shape[:-1]
    M = int(np.prod(lead)) if lead else 1
    x2d = x.reshape(M, x.shape[-1])

    # Row tiling: 8-aligned tile of up to TM_MAX rows; pad rows with zeros.
    m8 = _round_up(max(M, 1), SUBLANE)
    if m8 <= TM_MAX:
        TM, M_pad = m8, m8
    else:
        TM, M_pad = TM_MAX, _round_up(M, TM_MAX)
    grid = (M_pad // TM,)

    K_pad = wts[0].shape[0]
    xp = jnp.zeros((M_pad, K_pad), cdtype).at[:M, :in_dim].set(x2d.astype(cdtype))

    inputs = [xp] + list(wts)
    in_specs = [pl.BlockSpec((TM, K_pad), lambda i: (i, 0))]
    # Weights: full block, constant index map -> resident across the row grid.
    in_specs += [pl.BlockSpec(wt.shape, lambda i: (0, 0)) for wt in wts]

    use_masks = bool(training)
    if use_masks:
        if rng is None:
            rng = jax.random.PRNGKey(0)
        keep_prob = float(min(max(1.0 - float(p), 0.0), 1.0))
        scale = (1.0 / keep_prob) if keep_prob > 0.0 else 0.0  # p>=1 -> drop all
        mkeys = jax.random.split(rng, n_layers)
        for li, wt in enumerate(wts):
            n_pad = wt.shape[1]
            keep = jax.random.bernoulli(mkeys[li], keep_prob, (M_pad, n_pad))
            mask = keep.astype(cdtype) * jnp.asarray(scale, dtype=cdtype)
            inputs.append(mask)
            in_specs.append(pl.BlockSpec((TM, n_pad), lambda i: (i, 0)))

    N_pad = wts[-1].shape[1]
    out = pl.pallas_call(
        _make_prenet_kernel(n_layers, use_masks, cdtype, jnp.float32),
        out_shape=jax.ShapeDtypeStruct((M_pad, N_pad), jnp.float32),
        grid=grid,
        in_specs=in_specs,
        out_specs=pl.BlockSpec((TM, N_pad), lambda i: (i, 0)),
        compiler_params=pltpu.CompilerParams(
            dimension_semantics=("parallel",)),   # v7x: rows sharded over 2 TCs
    )(*inputs)

    return out[:M, :out_dims[-1]].reshape(*lead, out_dims[-1])


# ------------------------- deterministic params -----------------------------
def _xavier_uniform_relu(key, out_size, in_size):
    # LinearNorm: xavier_uniform_ with gain = calculate_gain('relu') = sqrt(2)
    gain = np.sqrt(2.0)
    bound = gain * np.sqrt(6.0 / (in_size + out_size))
    return jax.random.uniform(key, (out_size, in_size), jnp.float32,
                              minval=-bound, maxval=bound)


def make_prenet_params(key):
    in_sizes = [PRENET_INPUT_DIM] + PRENET_OUT_SIZES[:-1]
    keys = jax.random.split(key, len(PRENET_OUT_SIZES))
    return [_xavier_uniform_relu(k, o, i)
            for k, i, o in zip(keys, in_sizes, PRENET_OUT_SIZES)]


# --------------------------------- main -------------------------------------
if __name__ == "__main__":
    root = jax.random.PRNGKey(0)
    kx, kw, kd = jax.random.split(root, 3)

    # batch=2, seq=8, feature dim = prenet_input_dim = 32
    x = jax.random.normal(kx, (2, 8, PRENET_INPUT_DIM), jnp.float32)
    weights = make_prenet_params(kw)               # PyTorch (out, in) layout
    prepared = prepare_prenet_weights(weights)     # one-time transpose/pad/cast

    # --- eval mode (dropout identity): compare against a pure-JAX reference
    #     that applies the same bf16-input / f32-accumulate quantization.
    out = jax.block_until_ready(prenet_forward(x, prepared, training=False))
    ref = x.reshape(-1, PRENET_INPUT_DIM)
    for w in weights:
        y = jnp.dot(ref.astype(jnp.bfloat16),
                    jnp.transpose(w).astype(jnp.bfloat16),
                    preferred_element_type=jnp.float32)
        ref = jnp.maximum(y, 0.0)
    ref = ref.reshape(2, 8, PRENET_OUT_SIZES[-1])
    np.testing.assert_allclose(np.asarray(out), np.asarray(ref),
                               rtol=1e-3, atol=1e-3)

    # --- training mode, p=0.0: exercises the fused dropout path, must equal eval.
    out_p0 = jax.block_until_ready(
        prenet_forward(x, prepared, p=0.0, training=True, rng=kd))
    np.testing.assert_allclose(np.asarray(out_p0), np.asarray(out),
                               rtol=1e-6, atol=1e-6)

    # --- training mode, p=0.5: stochastic inverted dropout.
    out_tr = jax.block_until_ready(
        prenet_forward(x, prepared, p=PRENET_DROPOUT_P, training=True, rng=kd))
    assert out_tr.shape == (2, 8, PRENET_OUT_SIZES[-1])
    assert bool(jnp.all(jnp.isfinite(out_tr)))

    print("KERNEL_OK")
</pallas_src>

<mosaic_0001>
module attributes {stable_mosaic.version = 11 : i64} {
  func.func @kernel(%arg0: i32, %arg1: memref<16x128xbf16, #tpu.memory_space<vmem>>, %arg2: memref<128x128xbf16, #tpu.memory_space<vmem>>, %arg3: memref<128x128xbf16, #tpu.memory_space<vmem>>, %arg4: memref<16x128xf32, #tpu.memory_space<vmem>>) attributes {dimension_semantics = [#tpu.dimension_semantics<parallel>], iteration_bounds = array<i64: 1>, scalar_prefetch = 0 : i64, scratch_operands = 0 : i64, tpu.core_type = #tpu.core_type<tc>, window_params = [{transform_indices = @transform_0, window_bounds = array<i64: 16, 128>}, {pipeline_mode = #tpu.pipeline_mode<synchronous>, transform_indices = @transform_1, window_bounds = array<i64: 128, 128>}, {pipeline_mode = #tpu.pipeline_mode<synchronous>, transform_indices = @transform_2, window_bounds = array<i64: 128, 128>}, {transform_indices = @transform_3, window_bounds = array<i64: 16, 128>}]} {
    %c0 = arith.constant 0 : index
    %c0_0 = arith.constant 0 : index
    %0 = vector.load %arg1[%c0, %c0_0] : memref<16x128xbf16, #tpu.memory_space<vmem>>, vector<16x128xbf16>
    %c0_1 = arith.constant 0 : index
    %c0_2 = arith.constant 0 : index
    %1 = vector.load %arg2[%c0_1, %c0_2] : memref<128x128xbf16, #tpu.memory_space<vmem>>, vector<128x128xbf16>
    %cst = arith.constant dense<0.000000e+00> : vector<16x128xf32>
    %2 = tpu.matmul %0, %1, %cst {dimension_numbers = #tpu.dot_dimension_numbers<[1], [0], [0], [1], [0, 0, 1, 1], [], []>} : vector<16x128xbf16>, vector<128x128xbf16>, vector<16x128xf32> -> vector<16x128xf32>
    %cst_3 = arith.constant 0.000000e+00 : f32
    %3 = vector.broadcast %cst_3 : f32 to vector<16x128xf32>
    %4 = arith.maximumf %2, %3 : vector<16x128xf32>
    %5 = arith.truncf %4 : vector<16x128xf32> to vector<16x128xbf16>
    %c0_4 = arith.constant 0 : index
    %c0_5 = arith.constant 0 : index
    %6 = vector.load %arg3[%c0_4, %c0_5] : memref<128x128xbf16, #tpu.memory_space<vmem>>, vector<128x128xbf16>
    %cst_6 = arith.constant dense<0.000000e+00> : vector<16x128xf32>
    %7 = tpu.matmul %5, %6, %cst_6 {dimension_numbers = #tpu.dot_dimension_numbers<[1], [0], [0], [1], [0, 0, 1, 1], [], []>} : vector<16x128xbf16>, vector<128x128xbf16>, vector<16x128xf32> -> vector<16x128xf32>
    %cst_7 = arith.constant 0.000000e+00 : f32
    %8 = vector.broadcast %cst_7 : f32 to vector<16x128xf32>
    %9 = arith.maximumf %7, %8 : vector<16x128xf32>
    %c0_8 = arith.constant 0 : index
    %c0_9 = arith.constant 0 : index
    %10 = vector.load %arg4[%c0_8, %c0_9] : memref<16x128xf32, #tpu.memory_space<vmem>>, vector<16x128xf32>
    tpu.vector_store %arg4[%c0_8, %c0_9], %9 {strides = array<i32>} : memref<16x128xf32, #tpu.memory_space<vmem>>, vector<16x128xf32>,
    return
  }
  func.func @transform_0(%arg0: i32) -> (i32, i32) {
    %c0_i32 = arith.constant 0 : i32
    %c0_i32_0 = arith.constant 0 : i32
    return %arg0, %c0_i32 : i32, i32
  }
  func.func @transform_1(%arg0: i32) -> (i32, i32) {
    %c0_i32 = arith.constant 0 : i32
    %c0_i32_0 = arith.constant 0 : i32
    %c0_i32_1 = arith.constant 0 : i32
    return %c0_i32, %c0_i32_0 : i32, i32
  }
  func.func @transform_2(%arg0: i32) -> (i32, i32) {
    %c0_i32 = arith.constant 0 : i32
    %c0_i32_0 = arith.constant 0 : i32
    %c0_i32_1 = arith.constant 0 : i32
    return %c0_i32, %c0_i32_0 : i32, i32
  }
  func.func @transform_3(%arg0: i32) -> (i32, i32) {
    %c0_i32 = arith.constant 0 : i32
    %c0_i32_0 = arith.constant 0 : i32
    return %arg0, %c0_i32 : i32, i32
  }
}

</mosaic_0001>

<bundles_post_ra>
// kernel: tpu_custom_call.1
= control target key start
LH: loop header
LB: loop body
LE: loop exit
PB: predicated region body
PF: predicated region fallthrough
CT: control target
= control target key end

     0   :  { %8 = vsyncpa [#allocation3], 0  ;;  %s590_s0 = inlined_call_operand.hbm [shape: bf16[16,128], index: 0, kind: input, shape index: {}]   ;;  %s591_s1 = inlined_call_operand.hbm [shape: bf16[128,128], index: 1, kind: input, shape index: {}]   ;;  %s592_s2 = inlined_call_operand.hbm [shape: bf16[128,128], index: 2, kind: input, shape index: {}]   ;;  %s593_s3 = inlined_call_operand.hbm [shape: f32[16,128], index: 3, kind: output, shape index: {}]  }
   0x1   :  { %9 = vsyncpa [#allocation6], 0 }
   0x2   :  { %10 = vsyncpa [#allocation4], 0  ;;  %s496_s12 = smov [#allocation5]   ;;  %s497_s14 = smov [#allocation2]  }
   0x3   :  { %s28_s13 = sshll.u32 %s496_s12, 4  ;;  %s16_s15 = sshll.u32 %s497_s14, 4  ;;  %s29_s13 = int_to_ptr.vmem [resolvable:$true] %s28_s13  ;;  %s526_s15 = int_to_ptr.vmem [resolvable:$true] %s16_s15 }
   0x4   :  { %s402_s18 = scalar_lea.hbm %s591_s1, 1024 }
   0x5   :  { %p403_p0 = scmp.ne.s32.totalorder %s591_s1, %s402_s18  ;;  %p406_p1 = scmp.lt.u32.totalorder %s402_s18, %s591_s1 }
   0x7   :  { %p408_p2 = pnand %p406_p1, %p403_p0 }
   0x9   :  { %411 = shalt.err (!%p408_p2)
}
   0xa   :  { %s412_s23 = scalar_lea.vmem %s29_s13, 1024  ;;  %p417_p4 = scmp.lt.s32.totalorder %s29_s13, %s29_s13 }
   0xb   :  { %p413_p3 = scmp.ne.s32.totalorder %s29_s13, %s412_s23  ;;  %p418_p5 = scmp.lt.s32.totalorder %s412_s23, %s412_s23 }
   0xd   :  { %p419_p6 = por %p418_p5, %p417_p4 }
   0xf   :  { %p420_p7 = pnand %p419_p6, %p413_p3 }
  0x11   :  { %423 = shalt.err (!%p420_p7)
}
  0x12   :  { %s498_s24 = smov 64   ;;  %s499_s25 = smov 4  }
  0x13   :  { %34 = dma.hbm_to_vmem [thread:$0]  %s591_s1, 1024, %s29_s13, [#allocation6], %s498_s24, %s498_s24, %s499_s25  }
  0x14   :  { %s424_s30 = scalar_lea.hbm %s590_s0, 128 }
  0x15   :  { %p425_p8 = scmp.ne.s32.totalorder %s590_s0, %s424_s30  ;;  %p428_p9 = scmp.lt.u32.totalorder %s424_s30, %s590_s0 }
  0x17   :  { %p430_p10 = pnand %p428_p9, %p425_p8 }
  0x19   :  { %433 = shalt.err (!%p430_p10)
}
  0x1a   :  { %s434_s8 = scalar_lea.vmem %s526_s15, 128  ;;  %p439_p12 = scmp.lt.s32.totalorder %s526_s15, %s526_s15 }
  0x1b   :  { %p435_p11 = scmp.ne.s32.totalorder %s526_s15, %s434_s8  ;;  %p440_p13 = scmp.lt.s32.totalorder %s434_s8, %s434_s8 }
  0x1d   :  { %p441_p0 = por %p440_p13, %p439_p12 }
  0x1f   :  { %p442_p1 = pnand %p441_p0, %p435_p11 }
  0x21   :  { %445 = shalt.err (!%p442_p1)
}
  0x22   :  { %22 = dma.hbm_to_vmem [thread:$0]  %s590_s0, 128, %s526_s15, [#allocation3], %s498_s24, %s498_s24, %s499_s25  }
  0x23   :  { %s500_s10 = smov [#allocation7]   ;;  %s446_s14 = scalar_lea.hbm %s592_s2, 1024 }
  0x24   :  { %s40_s11 = sshll.u32 %s500_s10, 4  ;;  %p447_p2 = scmp.ne.s32.totalorder %s592_s2, %s446_s14  ;;  %s41_s11 = int_to_ptr.vmem [resolvable:$true] %s40_s11 }
  0x25   :  { %p450_p3 = scmp.lt.u32.totalorder %s446_s14, %s592_s2 }
  0x27   :  { %p452_p4 = pnand %p450_p3, %p447_p2 }
  0x29   :  { %455 = shalt.err (!%p452_p4)
}
  0x2a   :  { %s456_s20 = scalar_lea.vmem %s41_s11, 1024  ;;  %p461_p6 = scmp.lt.s32.totalorder %s41_s11, %s41_s11 }
  0x2b   :  { %p457_p5 = scmp.ne.s32.totalorder %s41_s11, %s456_s20  ;;  %p462_p7 = scmp.lt.s32.totalorder %s456_s20, %s456_s20 }
  0x2d   :  { %p463_p8 = por %p462_p7, %p461_p6 }
  0x2f   :  { %p464_p9 = pnand %p463_p8, %p457_p5 }
  0x31   :  { %467 = shalt.err (!%p464_p9)
}
  0x32   :  { %46 = dma.hbm_to_vmem [thread:$0]  %s592_s2, 1024, %s41_s11, [#allocation6], %s498_s24, %s498_s24, %s499_s25  }
  0x33   :  { %490 = dma.done.wait [#allocation3], 128  }
  0x34   :  { %491 = vsyncadd [#allocation3], 4294967168 }
  0x35   :  { %492 = dma.done.wait [#allocation6], 2048  }
  0x36   :  { %493 = vsyncadd [#allocation6], 4294965248  ;;  %v501_v0 = vmov 0.0   ;;  %vm502_vm0 = vmmov 0   ;;  %v385_v1 = vld [vmem:[#allocation5] sm:$0xff]   ;;  %v386_v2 = vld [vmem:[#allocation5 + $0x8] sm:$0xff]  }
  0x37   :  { %335 = vmatprep.subr.bf16.mxu0 %v501_v0  ;;  %351 = vmatprep.mubr.msk.bf16.mxu0 %vm502_vm0, %v501_v0  ;;  %v387_v3 = vld [vmem:[#allocation5 + $0x10] sm:$0xff]   ;;  %v394_v4 = vld [vmem:[#allocation7] sm:$0xff]   ;;  %v388_v5 = vld [vmem:[#allocation5 + $0x18] sm:$0xff]   ;;  %s503_s2 = smov [#allocation8]  }
  0x38   :  { %355 = vmatprep.subr.bf16.mxu1 %v501_v0  ;;  %371 = vmatprep.mubr.msk.bf16.mxu1 %vm502_vm0, %v501_v0  ;;  %v395_v6 = vld [vmem:[#allocation7 + $0x8] sm:$0xff]   ;;  %v389_v7 = vld [vmem:[#allocation5 + $0x20] sm:$0xff]   ;;  %v396_v8 = vld [vmem:[#allocation7 + $0x10] sm:$0xff]   ;;  %s287_s21 = sshll.u32 %s503_s2, 4  ;;  %s288_s21 = int_to_ptr.vmem [resolvable:$true] %s287_s21 }
  0x39   :  { %336 = vmatpush3.bf16.msra.mxu0 %v385_v1  ;;  %356 = vmatpush3.bf16.msra.mxu1 %v394_v4  ;;  %v390_v9 = vld [vmem:[#allocation5 + $0x28] sm:$0xff]   ;;  %v397_v10 = vld [vmem:[#allocation7 + $0x18] sm:$0xff]   ;;  %v391_v11 = vld [vmem:[#allocation5 + $0x30] sm:$0xff]   ;;  %s468_s22 = scalar_lea.vmem %s288_s21, 256  ;;  %p473_p11 = scmp.lt.s32.totalorder %s288_s21, %s288_s21 }
  0x3a   :  { %337 = vmatprep.subr.bf16.mxu0 %v501_v0  ;;  %357 = vmatprep.subr.bf16.mxu1 %v501_v0  ;;  %v398_v12 = vld [vmem:[#allocation7 + $0x20] sm:$0xff]   ;;  %v392_v13 = vld [vmem:[#allocation5 + $0x38] sm:$0xff]   ;;  %v399_v14 = vld [vmem:[#allocation7 + $0x28] sm:$0xff]   ;;  %p469_p10 = scmp.ne.s32.totalorder %s288_s21, %s468_s22  ;;  %p474_p12 = scmp.lt.s32.totalorder %s468_s22, %s468_s22 }
  0x3b   :  { %v393_v15 = vld [vmem:[#allocation2] sm:$0xff]   ;;  %v400_v16 = vld [vmem:[#allocation7 + $0x30] sm:$0xff]  }
  0x3c   :  { %v401_v17 = vld [vmem:[#allocation7 + $0x38] sm:$0xff]   ;;  %p475_p13 = por %p474_p12, %p473_p11 }
  0x3d   :  { %338 = vmatpush3.bf16.msra.mxu0 %v386_v2  ;;  %358 = vmatpush3.bf16.msra.mxu1 %v395_v6 }
  0x3e   :  { %339 = vmatprep.subr.bf16.mxu0 %v501_v0  ;;  %359 = vmatprep.subr.bf16.mxu1 %v501_v0  ;;  %p476_p0 = pnand %p475_p13, %p469_p10 }
  0x41   :  { %340 = vmatpush3.bf16.msra.mxu0 %v387_v3  ;;  %360 = vmatpush3.bf16.msra.mxu1 %v396_v8 }
  0x42   :  { %341 = vmatprep.subr.bf16.mxu0 %v501_v0  ;;  %361 = vmatprep.subr.bf16.mxu1 %v501_v0 }
  0x45   :  { %342 = vmatpush3.bf16.msra.mxu0 %v388_v5  ;;  %362 = vmatpush3.bf16.msra.mxu1 %v397_v10 }
  0x46   :  { %343 = vmatprep.subr.bf16.mxu0 %v501_v0  ;;  %363 = vmatprep.subr.bf16.mxu1 %v501_v0 }
  0x49   :  { %344 = vmatpush3.bf16.msra.mxu0 %v389_v7  ;;  %364 = vmatpush3.bf16.msra.mxu1 %v398_v12 }
  0x4a   :  { %345 = vmatprep.subr.bf16.mxu0 %v501_v0  ;;  %365 = vmatprep.subr.bf16.mxu1 %v501_v0 }
  0x4d   :  { %346 = vmatpush3.bf16.msra.mxu0 %v390_v9  ;;  %366 = vmatpush3.bf16.msra.mxu1 %v399_v14 }
  0x4e   :  { %347 = vmatprep.subr.bf16.mxu0 %v501_v0  ;;  %367 = vmatprep.subr.bf16.mxu1 %v501_v0 }
  0x51   :  { %348 = vmatpush3.bf16.msra.mxu0 %v391_v11  ;;  %368 = vmatpush3.bf16.msra.mxu1 %v400_v16 }
  0x52   :  { %349 = vmatprep.subr.bf16.mxu0 %v501_v0  ;;  %369 = vmatprep.subr.bf16.mxu1 %v501_v0 }
  0x55   :  { %350 = vmatpush3.bf16.msra.mxu0 %v392_v13  ;;  %370 = vmatpush3.bf16.msra.mxu1 %v401_v17 }
  0x58   :  { %352 = vmatmul.mubr.bf16.vlgmr.msra.gmra.mrb[0].mxu0 %v393_v15 }
 0x12b   :  { %v163_v18 = vpop.f32.mrb[0].mxu0 }
 0x12c   :  { %v353_v19 = vpop.f32.mrb[1].mxu0  ;;  %v170_v21 = vmax.f32 %v163_v18, 0.0 }
 0x12d   :  { %v166_v20 = vpop.f32.mrb[2].mxu0 }
 0x12e   :  { %v171_v22 = vmax.f32 %v166_v20, 0.0  ;;  %v354_v23 = vpop.f32.mrb[3].mxu0 }
 0x130   :  { %v172_v24 = vpack.c.bf16 %v171_v22, %v170_v21 }
 0x132   :  { %372 = vmatmul.mubr.bf16.vlgmr.msra.gmra.mrb[0].mxu1 %v172_v24 }
 0x205   :  { %v271_v25 = vpop.f32.mrb[0].mxu1 }
 0x206   :  { %v278_v26 = vmax.f32 %v271_v25, 0.0  ;;  %v373_v27 = vpop.f32.mrb[1].mxu1 }
 0x207   :  { %v274_v28 = vpop.f32.mrb[2].mxu1 }
 0x208   :  { %280 = vst [vmem:[#allocation8] sm:$0xff] %v278_v26  ;;  %v279_v29 = vmax.f32 %v274_v28, 0.0  ;;  %v374_v30 = vpop.f32.mrb[3].mxu1 }
 0x20a   :  { %281 = vst [vmem:[#allocation8 + $0x8] sm:$0xff] %v279_v29 }
 0x20b   :  { %479 = shalt.err (!%p476_p0)
}
 0x20c   :  { %s480_s25 = scalar_lea.hbm %s593_s3, 256 }
 0x20d   :  { %p481_p1 = scmp.ne.s32.totalorder %s593_s3, %s480_s25  ;;  %p484_p2 = scmp.lt.u32.totalorder %s480_s25, %s593_s3 }
 0x20f   :  { %p486_p3 = pnand %p484_p2, %p481_p1 }
 0x211   :  { %489 = shalt.err (!%p486_p3)
}
 0x212   :  { %s504_s30 = smov 128   ;;  %s505_s4 = smov 8  }
 0x213   :  { %293 = dma.vmem_to_hbm [thread:$0]  %s288_s21, 256, %s593_s3, [#allocation4], %s504_s30, %s504_s30, %s505_s4  }
 0x214   :  { %494 = dma.done.wait [#allocation4], 256  }
 0x215   :  { %495 = vsyncadd [#allocation4], 4294967040 }
 0x216   :  { %297 = vsyncpa [#allocation3], 1 }
 0x217   :  { %298 = vsyncpa [#allocation6], 1 }
 0x218   :  { %299 = vsyncpa [#allocation4], 1 }

</bundles_post_ra>
